<compile_context>
chip_gen: v5e
topology: v5e:2x2
jax: 0.10.0
libtpu: 0.0.40
codegen_flags: <defaults>
</compile_context>

<pallas_src>
import jax
import jax.numpy as jnp
from jax.experimental import pallas as pl
from jax.experimental.pallas import tpu as pltpu

SMOOTH = 1e-9
LANES = 128
TARGET_BLOCK_BYTES = 1 << 20   # ~1 MiB per input block (per buffer)


def _make_dice_sums_kernel(hw, chunk, need_mask):
    """Kernel factory: per-(batch, chunk) block, emit per-channel partial sums.

    pred_ref / true_ref : (1, C, chunk) block of (B, C, HW) at (b, :, k*chunk:)
    out_ref             : (1, 1, C, 3) slot of the (B, K, C, 3) partial-sum array
                          col 0 = sum(p*t), col 1 = sum(p), col 2 = sum(t)
    """

    def kernel(pred_ref, true_ref, out_ref):
        p = pred_ref[0].astype(jnp.float32)   # (C, chunk)
        t = true_ref[0].astype(jnp.float32)   # (C, chunk)

        if need_mask:
            # Ragged edge block: lanes past the true spatial extent hold
            # unspecified data — zero them before ALL three sums.
            k = pl.program_id(1)
            idx = jax.lax.broadcasted_iota(jnp.int32, p.shape, 1) + k * chunk
            valid = idx < hw
            p = jnp.where(valid, p, 0.0)
            t = jnp.where(valid, t, 0.0)

        tp = jnp.sum(p * t, axis=1, keepdims=True)   # (C, 1)
        sp = jnp.sum(p, axis=1, keepdims=True)       # (C, 1)
        st = jnp.sum(t, axis=1, keepdims=True)       # (C, 1)
        # Single store per step (no sublane-masked RMW accumulation).
        out_ref[0, 0] = jnp.concatenate([tp, sp, st], axis=1)   # (C, 3)

    return kernel


def dice_loss_squared(output, y_true, *, _chunk_override=None):
    """Pallas implementation of DiceLossSquared.forward (default args)."""
    assert output.shape == y_true.shape and output.ndim >= 3
    B, C = output.shape[0], output.shape[1]
    HW = 1
    for d in output.shape[2:]:
        HW *= d

    # Free, contiguous reshapes — no pad, no transpose, no dtype change in HBM.
    pred = output.reshape(B, C, HW)
    true = y_true.reshape(B, C, HW)

    # Chunk the flat spatial axis: lane-aligned chunks sized for ~1 MiB blocks.
    itemsize = max(jnp.dtype(pred.dtype).itemsize, jnp.dtype(true.dtype).itemsize)
    chunk = max(LANES, (TARGET_BLOCK_BYTES // (C * itemsize)) // LANES * LANES)
    if _chunk_override is not None:
        chunk = _chunk_override
    if chunk >= HW:
        chunk = HW                        # whole spatial extent in one block
    assert chunk == HW or chunk % LANES == 0
    K = pl.cdiv(HW, chunk)
    need_mask = (HW % chunk) != 0         # ragged edge block -> in-kernel mask

    flops = 4 * B * C * HW                # mul + three adds per element
    bytes_accessed = (B * C * HW
                      * (jnp.dtype(pred.dtype).itemsize + jnp.dtype(true.dtype).itemsize)
                      + B * K * C * 3 * 4)

    sums = pl.pallas_call(
        _make_dice_sums_kernel(HW, chunk, need_mask),
        out_shape=jax.ShapeDtypeStruct((B, K, C, 3), jnp.float32),
        grid=(B, K),
        in_specs=[
            pl.BlockSpec((1, C, chunk), lambda b, k: (b, 0, k)),
            pl.BlockSpec((1, C, chunk), lambda b, k: (b, 0, k)),
        ],
        out_specs=pl.BlockSpec((1, 1, C, 3), lambda b, k: (b, k, 0, 0)),
        compiler_params=pltpu.CompilerParams(
            # Every (b, k) step writes its own output slot -> fully parallel grid
            # (both v7x TensorCores usable even when C is small/odd).
            dimension_semantics=("parallel", "parallel"),
            vmem_limit_bytes=32 * 1024 * 1024,
        ),
        cost_estimate=pl.CostEstimate(
            flops=flops, transcendentals=0, bytes_accessed=bytes_accessed),
    )(pred, true)

    # Finalize: O(C) scalar work in plain JAX.
    per_c = jnp.sum(sums, axis=(0, 1))                 # (C, 3)
    tp, sp, st = per_c[:, 0], per_c[:, 1], per_c[:, 2]
    dsc = (2.0 * tp + SMOOTH) / (sp + st + SMOOTH)
    dice_loss = jnp.sum(1.0 - dsc) / C
    return dice_loss ** 2


def _reference(output, y_true):
    # Pure-JAX mirror of the PyTorch forward.
    C = output.shape[1]
    loss = 0.0
    for c in range(C):
        pred = output[:, c].reshape(-1).astype(jnp.float32)
        true = y_true[:, c].reshape(-1).astype(jnp.float32)
        inter = jnp.sum(pred * true)
        dsc = (2.0 * inter + SMOOTH) / (jnp.sum(pred) + jnp.sum(true) + SMOOTH)
        loss = loss + (1.0 - dsc)
    loss = loss / C
    return loss ** 2


if __name__ == "__main__":
    key = jax.random.PRNGKey(0)
    k1, k2, k3, k4 = jax.random.split(key, 4)

    # Main case: B=2, C=4, 16x16 spatial (HW = 256, single block per batch elem).
    B, C, H, W = 2, 4, 16, 16
    output = jax.nn.sigmoid(jax.random.normal(k1, (B, C, H, W), jnp.float32))
    y_true = (jax.random.uniform(k2, (B, C, H, W)) > 0.5).astype(jnp.float32)

    loss = jax.block_until_ready(dice_loss_squared(output, y_true))
    ref = _reference(output, y_true)
    assert jnp.allclose(loss, ref, rtol=1e-5, atol=1e-6), (loss, ref)

    # Ragged-tail case: HW = 180 with a forced 128-element chunk exercises the
    # in-kernel edge-block masking path (no jnp.pad anywhere).
    out2 = jax.nn.sigmoid(jax.random.normal(k3, (1, 3, 9, 20), jnp.float32))
    tru2 = (jax.random.uniform(k4, (1, 3, 9, 20)) > 0.5).astype(jnp.float32)
    loss2 = jax.block_until_ready(dice_loss_squared(out2, tru2, _chunk_override=128))
    ref2 = _reference(out2, tru2)
    assert jnp.allclose(loss2, ref2, rtol=1e-5, atol=1e-6), (loss2, ref2)

    print("KERNEL_OK")
</pallas_src>

<mosaic_0001>
module attributes {stable_mosaic.version = 11 : i64} {
  func.func @kernel(%arg0: i32, %arg1: i32, %arg2: memref<1x4x256xf32, #tpu.memory_space<vmem>>, %arg3: memref<1x4x256xf32, #tpu.memory_space<vmem>>, %arg4: memref<1x1x4x3xf32, #tpu.memory_space<vmem>>) attributes {dimension_semantics = [#tpu.dimension_semantics<parallel>, #tpu.dimension_semantics<parallel>], iteration_bounds = array<i64: 2, 1>, scalar_prefetch = 0 : i64, scratch_operands = 0 : i64, tpu.core_type = #tpu.core_type<tc>, window_params = [{transform_indices = @transform_0, window_bounds = array<i64: 1, 4, 256>}, {transform_indices = @transform_1, window_bounds = array<i64: 1, 4, 256>}, {transform_indices = @transform_2, window_bounds = array<i64: 1, 1, 4, 3>}]} {
    %c0 = arith.constant 0 : index
    %c0_0 = arith.constant 0 : index
    %c0_1 = arith.constant 0 : index
    %0 = vector.load %arg2[%c0, %c0_0, %c0_1] : memref<1x4x256xf32, #tpu.memory_space<vmem>>, vector<1x4x256xf32>
    %1 = vector.shape_cast %0 : vector<1x4x256xf32> to vector<4x256xf32>
    %c0_2 = arith.constant 0 : index
    %c0_3 = arith.constant 0 : index
    %c0_4 = arith.constant 0 : index
    %2 = vector.load %arg3[%c0_2, %c0_3, %c0_4] : memref<1x4x256xf32, #tpu.memory_space<vmem>>, vector<1x4x256xf32>
    %3 = vector.shape_cast %2 : vector<1x4x256xf32> to vector<4x256xf32>
    %4 = arith.mulf %1, %3 : vector<4x256xf32>
    %cst = arith.constant dense<0.000000e+00> : vector<4xf32>
    %5 = vector.multi_reduction <add>, %4, %cst [1] : vector<4x256xf32> to vector<4xf32>
    %6 = vector.shape_cast %5 : vector<4xf32> to vector<4x1xf32>
    %cst_5 = arith.constant dense<0.000000e+00> : vector<4xf32>
    %7 = vector.multi_reduction <add>, %1, %cst_5 [1] : vector<4x256xf32> to vector<4xf32>
    %8 = vector.shape_cast %7 : vector<4xf32> to vector<4x1xf32>
    %cst_6 = arith.constant dense<0.000000e+00> : vector<4xf32>
    %9 = vector.multi_reduction <add>, %3, %cst_6 [1] : vector<4x256xf32> to vector<4xf32>
    %10 = vector.shape_cast %9 : vector<4xf32> to vector<4x1xf32>
    %11 = tpu.concatenate %6, %8, %10 in 1 : vector<4x1xf32>, vector<4x1xf32>, vector<4x1xf32> -> vector<4x3xf32>
    %c0_7 = arith.constant 0 : index
    %c0_8 = arith.constant 0 : index
    %c0_9 = arith.constant 0 : index
    %c0_10 = arith.constant 0 : index
    %12 = vector.load %arg4[%c0_7, %c0_8, %c0_9, %c0_10] : memref<1x1x4x3xf32, #tpu.memory_space<vmem>>, vector<1x1x4x3xf32>
    %13 = vector.shape_cast %12 : vector<1x1x4x3xf32> to vector<4x3xf32>
    %14 = vector.shape_cast %11 : vector<4x3xf32> to vector<1x1x4x3xf32>
    tpu.vector_store %arg4[%c0_7, %c0_8, %c0_9, %c0_10], %14 {strides = array<i32>} : memref<1x1x4x3xf32, #tpu.memory_space<vmem>>, vector<1x1x4x3xf32>,
    return
  }
  func.func @transform_0(%arg0: i32, %arg1: i32) -> (i32, i32, i32) {
    %c0_i32 = arith.constant 0 : i32
    %c0_i32_0 = arith.constant 0 : i32
    return %arg0, %c0_i32, %arg1 : i32, i32, i32
  }
  func.func @transform_1(%arg0: i32, %arg1: i32) -> (i32, i32, i32) {
    %c0_i32 = arith.constant 0 : i32
    %c0_i32_0 = arith.constant 0 : i32
    return %arg0, %c0_i32, %arg1 : i32, i32, i32
  }
  func.func @transform_2(%arg0: i32, %arg1: i32) -> (i32, i32, i32, i32) {
    %c0_i32 = arith.constant 0 : i32
    %c0_i32_0 = arith.constant 0 : i32
    %c0_i32_1 = arith.constant 0 : i32
    return %arg0, %arg1, %c0_i32, %c0_i32_0 : i32, i32, i32, i32
  }
}

</mosaic_0001>

<bundles_post_ra>
// kernel: tpu_custom_call.1
= control target key start
LH: loop header
LB: loop body
LE: loop exit
PB: predicated region body
PF: predicated region fallthrough
CT: control target
= control target key end

     0   :  { %7 = vsyncpa [#allocation3], 0  ;;  %s697_s0 = inlined_call_operand.hbm [shape: f32[2,4,256], index: 0, kind: input, shape index: {}]   ;;  %s698_s1 = inlined_call_operand.hbm [shape: f32[2,4,256], index: 1, kind: input, shape index: {}]   ;;  %s699_s2 = inlined_call_operand.vmem [shape: f32[2,1,4,3], index: 2, kind: output, shape index: {}]  }
   0x1   :  { %9 = vsyncpa [#allocation3 + $0x1], 0 }
   0x2   :  { %10 = vsyncpa [#allocation5], 0 }
   0x3   :  { %12 = vsyncpa [#allocation5 + $0x1], 0  ;;  %s596_s9 = smov 0   ;;  %s598_s10 = smov 0  }
   0x4   :  { %s600_s11 = smov 0   ;;  %s602_s12 = smov 0  }
   0x5   :  { %s604_s13 = smov 0   ;;  %s606_s14 = smov 0  }
   0x6 LB: > { %s387_s15 = sadd.s32 4294967295, %s579_s14   ;;  %s30_s16 = sadd.s32 1, %s575_s13  ;;  %s579_s14 = sphi %s606_s14, %s18_s14   ;;  %s575_s13 = sphi %s604_s13, %s706_s13   ;;  %s571_s12 = sphi %s602_s12, %s705_s12   ;;  %s567_s11 = sphi %s600_s11, %s704_s11   ;;  %s563_s10 = sphi %s598_s10, %s703_s10   ;;  %s559_s9 = sphi %s596_s9, %s702_s9  }
   0x7   : > { %p32_p0 = scmp.ge.s32.totalorder %s30_s16, 2  ;;  %s39_s17 = sadd.s32 1, %s567_s11 }
   0x8   : > { %p46_p1 = scmp.ne.s32.totalorder %s567_s11, %s563_s10  ;;  %p47_p2 = scmp.eq.s32.totalorder %s579_s14, 0 }
   0x9   : > { %s708_s16 = smov (%p32_p0, %s30_s16), 0  ;;  %p52_p4 = scmp.ne.s32.totalorder %s563_s10, %s559_s9 }
   0xa   : > { %p632_p3 = por %p47_p2, %p46_p1  ;;  %s34_s19 = ssub.s32 %s575_s13, %s708_s16 }
   0xb   : > { %p53_p5 = scmp.eq.s32.totalorder %s387_s15, 0  ;;  %p37_p6 = scmp.eq.s32.totalorder %s34_s19, 0 }
   0xc   : > { %p416_p8 = scmp.lt.s32.totalorder %s579_s14, 2  ;;  %s132_s22 = sand.u32 1, %s567_s11  }
   0xd   : > { %p639_p7 = por %p53_p5, %p52_p4  ;;  %s403_s23 = sshll.u32 %s575_s13, 3 }
   0xe   : > { %s645_s21 = scalar_select %p37_p6, %s567_s11, %s39_s17  }
   0xf   : > { %s391_s24 = sshll.u32 %s132_s22, 3  ;;  %s143_s27 = scalar_lea.hbm %s697_s0, %s403_s23 }
  0x10   : > { %s145_s28 = sshll.u32 %s143_s27, 4  ;;  %s136_s29 = scalar_lea.vmem [#allocation2], %s391_s24  ;;  %s146_s28 = int_to_ptr.hbm [resolvable:$true] %s145_s28 }
  0x11   : > { %s147_s30 = sshll.u32 %s136_s29, 4  ;;  %p410_p9 = pnand %p416_p8, %p632_p3  ;;  %s148_s30 = int_to_ptr.vmem [resolvable:$true] %s147_s30 }
  0x12   : > { %p397_p10 = scmp.ge.s32.totalorder %s579_s14, 1  ;;  %p174_p11 = scmp.lt.s32.totalorder %s579_s14, 3 }
  0x13   : > { %s133_s3 = scalar_lea.sflag [#allocation3], %s132_s22  ;;  %s165_s6 = scalar_lea.hbm %s698_s1, %s403_s23 }
  0x14   : > { %412 = dma.hbm_to_vmem [thread:$0]  (!%p410_p9), %s146_s28, 128, %s148_s30, %s133_s3  }
  0x15   : > { %p175_p12 = pnand %p397_p10, %p174_p11  ;;  %s167_s7 = sshll.u32 %s165_s6, 4  ;;  %s168_s7 = int_to_ptr.hbm [resolvable:$true] %s167_s7 }
  0x16   : > { %s158_s8 = scalar_lea.vmem [#allocation4], %s391_s24  ;;  %s155_s15 = scalar_lea.sflag [#allocation5], %s132_s22 }
  0x17   : > { %s169_s9 = sshll.u32 %s158_s8, 4  ;;  %178 = sbr.rel (%p175_p12) target bundleno = 179 (0xb3), region = 28  ;;  %s170_s9 = int_to_ptr.vmem [resolvable:$true] %s169_s9 }
  0x18   : > { %415 = dma.hbm_to_vmem [thread:$0]  (!%p410_p9), %s168_s7, 128, %s170_s9, %s155_s15  }
  0x19   : > { %s180_s17 = sand.u32 (!%p175_p12), 1, %s563_s10  }
  0x1a   : > { %s398_s18 = sshll.u32 (!%p175_p12), %s180_s17, 3  ;;  %s181_s19 = scalar_lea.sflag (!%p175_p12), [#allocation3], %s180_s17 }
  0x1b   : > { %s184_s25 = scalar_lea.vmem (!%p175_p12), [#allocation2], %s398_s18 }
  0x1c   : > { %550 = dma.done.wait (%p639_p7), %s181_s19, 128  }
  0x1d   : > { %552 = vsyncadd (%p639_p7), %s181_s19, 4294967168  ;;  %s191_s23 = scalar_lea.sflag [#allocation5], %s180_s17  ;;  %s194_s24 = scalar_lea.vmem [#allocation4], %s398_s18 }
  0x1e   : > { %554 = dma.done.wait (%p639_p7), %s191_s23, 128  }
  0x1f   : > { %556 = vsyncadd (%p639_p7), %s191_s23, 4294967168  ;;  %v232_v0 = vld [vmem:[%s184_s25] sm:$0xff]  ;;  %v233_v1 = vld [vmem:[%s194_s24] sm:$0xff]  ;;  %vm241_vm0 = vcmask 1043456   ;;  %p225_p13 = scmp.lt.s32.totalorder %s571_s12, 1  ;;  %vm269_vm1 = vcmask 7168  }
  0x20   : > { %v234_v2 = vmul.f32 %v233_v1, %v232_v0  ;;  %vm271_vm2 = vcmask 15360   ;;  %vm273_vm3 = vcmask 19456  }
  0x21   : > { %s710_s12 = smov (!%p225_p13, %s571_s12), 1 }
  0x22   : > { %236 = vst [vmem:[#allocation1] ss:$2 sm:$0xff] %v234_v2  ;;  %s400_s20 = sshll.u32 %s710_s12, 2 }
  0x23   : > { %s231_s27 = scalar_lea.vmem %s699_s2, %s400_s20 }
  0x29   : > { %v237_v3 = vld.sshfl [vmem:[#allocation1] sm:$0xff pattern:$0x75316420]  ;;  %v238_v4 = vld.sshfl [vmem:[#allocation1 + $0x8] sm:$0xff pattern:$0x75316420] }
  0x2a   : > { %v242_v5 = vsel %vm241_vm0, %v237_v3, 0.0  ;;  %v243_v6 = vsel %vm241_vm0, %v238_v4, 0.0  ;;  %248 = vst [vmem:[#allocation1] ss:$2 sm:$0xff] %v232_v0 }
  0x2b   : > { %v244_v7 = vadd.f32 %v243_v6, %v242_v5 }
  0x2d   : > { %245 = vadd.xlane.f32.xlu0 %v244_v7 }
  0x31   : > { %v249_v8 = vld.sshfl [vmem:[#allocation1] sm:$0xff pattern:$0x75316420]  ;;  %v250_v9 = vld.sshfl [vmem:[#allocation1 + $0x8] sm:$0xff pattern:$0x75316420] }
  0x32   : > { %v253_v10 = vsel %vm241_vm0, %v249_v8, 0.0  ;;  %v254_v11 = vsel %vm241_vm0, %v250_v9, 0.0  ;;  %259 = vst [vmem:[#allocation1] ss:$2 sm:$0xff] %v233_v1 }
  0x33   : > { %v255_v12 = vadd.f32 %v254_v11, %v253_v10 }
  0x35   : > { %256 = vadd.xlane.f32.xlu0 %v255_v12 }
  0x39   : > { %v260_v13 = vld.sshfl [vmem:[#allocation1] sm:$0xff pattern:$0x75316420]  ;;  %v261_v14 = vld.sshfl [vmem:[#allocation1 + $0x8] sm:$0xff pattern:$0x75316420] }
  0x3a   : > { %v264_v15 = vsel %vm241_vm0, %v260_v13, 0.0  ;;  %v265_v16 = vsel %vm241_vm0, %v261_v14, 0.0 }
  0x3b   : > { %v266_v17 = vadd.f32 %v265_v16, %v264_v15 }
  0x3d   : > { %267 = vadd.xlane.f32.xlu1 %v266_v17 }
  0xa0   : > { %v246_v18 = vpop.xlane.xlu0 %245 }
  0xa8   : > { %v257_v19 = vpop.xlane.xlu0 %256 }
  0xa9   : > { %v270_v20 = vsel %vm269_vm1, %v246_v18, %v257_v19 }
  0xb0   : > { %v268_v21 = vpop.xlane.xlu1 %267 }
  0xb1   : > { %v272_v22 = vsel %vm271_vm2, %v270_v20, %v268_v21 }
  0xb2   : > { %274 = vst.msk [vmem:[%s231_s27] sm:$0xf] %vm273_vm3, %v272_v22 }
  0xb3 PF: > { %s18_s14 = sadd.s32 1, %s579_s14   ;;  %s702_s9 = smov %s563_s10 }
  0xb4   : > { %p15_p0 = scmp.ge.s32.totalorder %s18_s14, 4   ;;  %s703_s10 = smov %s567_s11 }
  0xb5   : > { %s704_s11 = smov %s645_s21  ;;  %s705_s12 = smov %s575_s13 }
  0xb6   : > { %s706_s13 = smov %s708_s16  ;;  %17 = sbr.rel (!%p15_p0) target bundleno = 6 (0x6), region = 81 }
  0xbb   :  { %300 = vsyncpa [#allocation3], 1 }
  0xbc   :  { %302 = vsyncpa [#allocation3 + $0x1], 1 }
  0xbd   :  { %303 = vsyncpa [#allocation5], 1 }
  0xbe   :  { %305 = vsyncpa [#allocation5 + $0x1], 1 }

</bundles_post_ra>
